<compile_context>
chip_gen: v6e
topology: v6e:2x2x1
jax: 0.10.0
libtpu: 0.0.40
codegen_flags: <defaults>
</compile_context>

<pallas_src>
import functools

import jax
import jax.numpy as jnp
from jax.experimental import pallas as pl
from jax.experimental.pallas import tpu as pltpu

STATE_DIM = 8      # env.observation_space.shape[0] for LunarLander-v2
ACTION_DIM = 4     # env.action_space.n for LunarLander-v2
HIDDEN = 128


def _round_up(n, m):
    return (n + m - 1) // m * m


def actor_kernel(x_ref, w1_ref, b1_ref, w2_ref, b2_ref, out_ref):
    # ---- fc1: Linear(state_dim -> 128) + ReLU -------------------------------
    # bf16 MXU operands, f32 accumulation; elementwise math in f32.
    x = x_ref[...].astype(jnp.bfloat16)                       # [tb, S]
    h = jnp.dot(x, w1_ref[...], preferred_element_type=jnp.float32)
    h = jnp.maximum(h + b1_ref[...], 0.0)                     # [tb, 128] f32

    # ---- fc2: Linear(128 -> action_dim) -------------------------------------
    logits = jnp.dot(h.astype(jnp.bfloat16), w2_ref[...],
                     preferred_element_type=jnp.float32)
    logits = logits + b2_ref[...]                             # [tb, 4] f32

    # ---- Softmax over the 4 real action columns ------------------------------
    m = jnp.max(logits, axis=-1, keepdims=True)
    e = jnp.exp(logits - m)
    denom = jnp.sum(e, axis=-1, keepdims=True)
    # Exact normalization (memory-bound kernel; approx reciprocal saved nothing
    # and left ~1e-3 relative error in sum(probs)).
    out_ref[...] = (e / denom).astype(out_ref.dtype)          # [tb, 4] store


def prepare_actor_params(w1, b1, w2, b2):
    """One-time parameter prep: final dtypes/shapes for the kernel.

    Weights stored as [in, out] (transpose of PyTorch nn.Linear), biases [1, out].
    """
    w1b = w1.astype(jnp.bfloat16).reshape(STATE_DIM, HIDDEN)
    b1f = b1.astype(jnp.float32).reshape(1, HIDDEN)
    w2b = w2.astype(jnp.bfloat16).reshape(HIDDEN, ACTION_DIM)
    b2f = b2.astype(jnp.float32).reshape(1, ACTION_DIM)
    return w1b, b1f, w2b, b2f


@functools.partial(jax.jit, static_argnames=("tile_b",))
def actor_forward(state, w1b, b1f, w2b, b2f, *, tile_b=2048):
    """state: [B, STATE_DIM] -> action probabilities [B, ACTION_DIM] f32.

    Takes parameters already processed by prepare_actor_params().
    """
    B = state.shape[0]
    state = state.astype(jnp.float32)

    if B <= tile_b:
        # Small batch (action selection): single invocation, no grid/pipeline
        # machinery; everything (a few KB) is VMEM-resident.
        return pl.pallas_call(
            actor_kernel,
            out_shape=jax.ShapeDtypeStruct((B, ACTION_DIM), jnp.float32),
            in_specs=[pl.BlockSpec(memory_space=pltpu.MemorySpace.VMEM)] * 5,
            out_specs=pl.BlockSpec(memory_space=pltpu.MemorySpace.VMEM),
        )(state, w1b, b1f, w2b, b2f)

    # Batched rollout path: stream state/output tiles, keep weights resident
    # (constant index_maps), shard the batch axis across TensorCores.
    # Tile is ceil(B / n_tiles) rounded up to a sublane multiple, so padding is
    # bounded by 8*n_tiles rows (no full-tile jnp.pad in the common case).
    n_tiles = pl.cdiv(B, tile_b)
    tb = _round_up(pl.cdiv(B, n_tiles), 8)
    Bp = n_tiles * tb
    if Bp != B:
        state = jnp.pad(state, ((0, Bp - B), (0, 0)))

    probs = pl.pallas_call(
        actor_kernel,
        out_shape=jax.ShapeDtypeStruct((Bp, ACTION_DIM), jnp.float32),
        grid=(n_tiles,),
        in_specs=[
            pl.BlockSpec((tb, STATE_DIM), lambda i: (i, 0)),
            pl.BlockSpec((STATE_DIM, HIDDEN), lambda i: (0, 0)),
            pl.BlockSpec((1, HIDDEN), lambda i: (0, 0)),
            pl.BlockSpec((HIDDEN, ACTION_DIM), lambda i: (0, 0)),
            pl.BlockSpec((1, ACTION_DIM), lambda i: (0, 0)),
        ],
        out_specs=pl.BlockSpec((tb, ACTION_DIM), lambda i: (i, 0)),
        compiler_params=pltpu.CompilerParams(
            dimension_semantics=("parallel",),
            vmem_limit_bytes=32 * 1024 * 1024),
    )(state, w1b, b1f, w2b, b2f)

    # Contiguous leading-dim slice; a no-op when Bp == B.
    return probs[:B]


def init_actor_params(key):
    """Deterministic init mimicking PyTorch's default nn.Linear init:
    U(-1/sqrt(fan_in), 1/sqrt(fan_in)) for both weights and biases."""
    k1, k2, k3, k4 = jax.random.split(key, 4)
    bound1 = 1.0 / jnp.sqrt(jnp.float32(STATE_DIM))
    bound2 = 1.0 / jnp.sqrt(jnp.float32(HIDDEN))
    # stored as [in, out] so the kernel does x @ W (equiv. to x @ W_pt.T)
    w1 = jax.random.uniform(k1, (STATE_DIM, HIDDEN), jnp.float32, -bound1, bound1)
    b1 = jax.random.uniform(k2, (1, HIDDEN), jnp.float32, -bound1, bound1)
    w2 = jax.random.uniform(k3, (HIDDEN, ACTION_DIM), jnp.float32, -bound2, bound2)
    b2 = jax.random.uniform(k4, (1, ACTION_DIM), jnp.float32, -bound2, bound2)
    return w1, b1, w2, b2


def actor_reference(state, w1, b1, w2, b2):
    """Pure-JAX reference with matching bf16-operand / f32-accumulate matmuls.

    Deliberate precision choice: bf16 MXU operands (vs the fp32 PyTorch Actor),
    f32 accumulation and f32 softmax -- fine for PPO.
    """
    xb = state.astype(jnp.bfloat16)
    h = jnp.dot(xb, w1.astype(jnp.bfloat16), preferred_element_type=jnp.float32)
    h = jnp.maximum(h + b1, 0.0)
    logits = jnp.dot(h.astype(jnp.bfloat16), w2.astype(jnp.bfloat16),
                     preferred_element_type=jnp.float32) + b2
    return jax.nn.softmax(logits, axis=-1)


if __name__ == "__main__":
    key = jax.random.PRNGKey(0)
    k_params, k_state_small, k_state_big = jax.random.split(key, 3)

    w1, b1, w2, b2 = init_actor_params(k_params)
    params = prepare_actor_params(w1, b1, w2, b2)   # one-time prep (hoisted)

    # --- small batch (single-tile, gridless path), e.g. action selection ----
    batch_small = 8
    state_small = jax.random.normal(k_state_small, (batch_small, STATE_DIM),
                                    dtype=jnp.float32)
    probs_small = jax.block_until_ready(actor_forward(state_small, *params))
    ref_small = jax.block_until_ready(
        actor_reference(state_small, w1, b1, w2, b2))
    assert probs_small.shape == (batch_small, ACTION_DIM)
    assert jnp.allclose(jnp.sum(probs_small, axis=-1), 1.0, atol=1e-3)
    assert jnp.allclose(probs_small, ref_small, atol=2e-3, rtol=2e-3)

    # --- larger batch (multi-tile grid path), e.g. a PPO rollout chunk ------
    # (small tile here only to exercise the grid path; production default is
    #  tile_b=2048)
    batch_big = 256
    state_big = jax.random.normal(k_state_big, (batch_big, STATE_DIM),
                                  dtype=jnp.float32)
    probs_big = jax.block_until_ready(
        actor_forward(state_big, *params, tile_b=128))
    ref_big = jax.block_until_ready(actor_reference(state_big, w1, b1, w2, b2))
    assert probs_big.shape == (batch_big, ACTION_DIM)
    assert jnp.allclose(jnp.sum(probs_big, axis=-1), 1.0, atol=1e-3)
    assert jnp.allclose(probs_big, ref_big, atol=2e-3, rtol=2e-3)

    print("KERNEL_OK")
</pallas_src>

<mosaic_0001>
module attributes {stable_mosaic.version = 11 : i64} {
  func.func @actor_kernel(%arg0: memref<8x8xf32, #tpu.memory_space<vmem>>, %arg1: memref<8x128xbf16, #tpu.memory_space<vmem>>, %arg2: memref<1x128xf32, #tpu.memory_space<vmem>>, %arg3: memref<128x4xbf16, #tpu.memory_space<vmem>>, %arg4: memref<1x4xf32, #tpu.memory_space<vmem>>, %arg5: memref<8x4xf32, #tpu.memory_space<vmem>>) attributes {dimension_semantics = [], scalar_prefetch = 0 : i64, scratch_operands = 0 : i64, tpu.core_type = #tpu.core_type<tc>} {
    %c0 = arith.constant 0 : index
    %c0_0 = arith.constant 0 : index
    %0 = vector.load %arg0[%c0, %c0_0] : memref<8x8xf32, #tpu.memory_space<vmem>>, vector<8x8xf32>
    %1 = arith.truncf %0 : vector<8x8xf32> to vector<8x8xbf16>
    %c0_1 = arith.constant 0 : index
    %c0_2 = arith.constant 0 : index
    %2 = vector.load %arg1[%c0_1, %c0_2] : memref<8x128xbf16, #tpu.memory_space<vmem>>, vector<8x128xbf16>
    %cst = arith.constant dense<0.000000e+00> : vector<8x128xf32>
    %3 = tpu.matmul %1, %2, %cst {dimension_numbers = #tpu.dot_dimension_numbers<[1], [0], [0], [1], [0, 0, 1, 1], [], []>} : vector<8x8xbf16>, vector<8x128xbf16>, vector<8x128xf32> -> vector<8x128xf32>
    %c0_3 = arith.constant 0 : index
    %c0_4 = arith.constant 0 : index
    %4 = vector.load %arg2[%c0_3, %c0_4] : memref<1x128xf32, #tpu.memory_space<vmem>>, vector<1x128xf32>
    %5 = vector.broadcast %4 : vector<1x128xf32> to vector<8x128xf32>
    %6 = arith.addf %3, %5 : vector<8x128xf32>
    %cst_5 = arith.constant 0.000000e+00 : f32
    %7 = vector.broadcast %cst_5 : f32 to vector<8x128xf32>
    %8 = arith.maximumf %6, %7 : vector<8x128xf32>
    %9 = arith.truncf %8 : vector<8x128xf32> to vector<8x128xbf16>
    %c0_6 = arith.constant 0 : index
    %c0_7 = arith.constant 0 : index
    %10 = vector.load %arg3[%c0_6, %c0_7] : memref<128x4xbf16, #tpu.memory_space<vmem>>, vector<128x4xbf16>
    %cst_8 = arith.constant dense<0.000000e+00> : vector<8x4xf32>
    %11 = tpu.matmul %9, %10, %cst_8 {dimension_numbers = #tpu.dot_dimension_numbers<[1], [0], [0], [1], [0, 0, 1, 1], [], []>} : vector<8x128xbf16>, vector<128x4xbf16>, vector<8x4xf32> -> vector<8x4xf32>
    %c0_9 = arith.constant 0 : index
    %c0_10 = arith.constant 0 : index
    %12 = vector.load %arg4[%c0_9, %c0_10] : memref<1x4xf32, #tpu.memory_space<vmem>>, vector<1x4xf32>
    %13 = vector.broadcast %12 : vector<1x4xf32> to vector<8x4xf32>
    %14 = arith.addf %11, %13 : vector<8x4xf32>
    %cst_11 = arith.constant dense<0xFF800000> : vector<8xf32>
    %15 = vector.multi_reduction <maximumf>, %14, %cst_11 [1] : vector<8x4xf32> to vector<8xf32>
    %16 = vector.shape_cast %15 : vector<8xf32> to vector<8x1xf32>
    %17 = vector.broadcast %16 : vector<8x1xf32> to vector<8x4xf32>
    %18 = arith.subf %14, %17 : vector<8x4xf32>
    %19 = math.exp %18 : vector<8x4xf32>
    %cst_12 = arith.constant dense<0.000000e+00> : vector<8xf32>
    %20 = vector.multi_reduction <add>, %19, %cst_12 [1] : vector<8x4xf32> to vector<8xf32>
    %21 = vector.shape_cast %20 : vector<8xf32> to vector<8x1xf32>
    %22 = vector.broadcast %21 : vector<8x1xf32> to vector<8x4xf32>
    %23 = arith.divf %19, %22 : vector<8x4xf32>
    %c0_13 = arith.constant 0 : index
    %c0_14 = arith.constant 0 : index
    %24 = vector.load %arg5[%c0_13, %c0_14] : memref<8x4xf32, #tpu.memory_space<vmem>>, vector<8x4xf32>
    tpu.vector_store %arg5[%c0_13, %c0_14], %23 {strides = array<i32>} : memref<8x4xf32, #tpu.memory_space<vmem>>, vector<8x4xf32>,
    return
  }
}

</mosaic_0001>

<bundles_post_ra>
// kernel: actor_forward.1
= control target key start
LH: loop header
LB: loop body
LE: loop exit
PB: predicated region body
PF: predicated region fallthrough
CT: control target
= control target key end

     0   :  { %vm35_vm0 = vcmask 1043456   ;;  %v271_v0 = vmov 0.0   ;;  %vm272_vm1 = vmmov 0   ;;  %vm31_vm2 = vcmask 64512   ;;  %s345_s1 = inlined_call_operand.vmem [shape: bf16[8,128], index: 1, kind: input, shape index: {}]   ;;  %s346_s0 = inlined_call_operand.vmem [shape: f32[8,8], index: 0, kind: input, shape index: {}]   ;;  %s347_s3 = inlined_call_operand.vmem [shape: bf16[128,4], index: 3, kind: input, shape index: {}]   ;;  %s348_s2 = inlined_call_operand.vmem [shape: f32[1,128], index: 2, kind: input, shape index: {}]   ;;  %s349_s4 = inlined_call_operand.vmem [shape: f32[1,4], index: 4, kind: input, shape index: {}]   ;;  %s350_s5 = inlined_call_operand.vmem [shape: f32[8,4], index: 5, kind: output, shape index: {}]  }
   0x1   :  { %231 = vmatprep.subr.bf16.mxu0 %v271_v0  ;;  %v23_v1 = vld [vmem:[%s345_s1] sm:$0xf]  ;;  %233 = vmatprep.mubr.msk.bf16.mxu0 %vm272_vm1, %v271_v0  ;;  %v259_v5 = vld [vmem:[%s347_s3 + $0x38] sm:$0xff]   ;;  %v260_v6 = vld [vmem:[%s347_s3 + $0x30] sm:$0xff]   ;;  %vm192_vm3 = vcmask 31744  }
   0x2   :  { %v21_v2 = vld [vmem:[%s346_s0] sm:$0xff]  ;;  %v37_v3 = vsel %vm35_vm0, %v23_v1, 0  ;;  %237 = vmatprep.subr.bf16.mxu1 %v271_v0  ;;  %253 = vmatprep.mubr.msk.bf16.mxu1 %vm272_vm1, %v271_v0  ;;  %v261_v7 = vld [vmem:[%s347_s3 + $0x28] sm:$0xff]   ;;  %v263_v9 = vld [vmem:[%s347_s3 + $0x18] sm:$0xff]  }
   0x3   :  { %v22_v4 = vpack.c.bf16 %v21_v2, %v21_v2  ;;  %232 = vmatpush3.bf16.msra.mxu0 %v37_v3  ;;  %238 = vmatpush3.bf16.msra.mxu1 %v259_v5  ;;  %v262_v8 = vld [vmem:[%s347_s3 + $0x20] sm:$0xff]   ;;  %v264_v10 = vld [vmem:[%s347_s3 + $0x10] sm:$0xff]   ;;  %v265_v11 = vld [vmem:[%s347_s3 + $0x8] sm:$0xff]  }
   0x4   :  { %239 = vmatprep.subr.bf16.mxu1 %v271_v0  ;;  %v266_v12 = vld [vmem:[%s347_s3] sm:$0xff]  }
   0x5   :  { %v209_v13 = vld [vmem:[%s348_s2] ss:$0 sm:$0xff] }
   0x6   :  { %234 = vmatmul.mubr.msk.bf16.vlgmr.msra.gmra.mxu0 %vm31_vm2, %v22_v4  ;;  %v211_v21 = vld [vmem:[%s349_s4] ss:$0 sm:$0xff] }
   0x7   :  { %240 = vmatpush3.bf16.msra.mxu1 %v260_v6 }
   0x8   :  { %241 = vmatprep.subr.bf16.mxu1 %v271_v0 }
   0xb   :  { %242 = vmatpush3.bf16.msra.mxu1 %v261_v7 }
   0xc   :  { %243 = vmatprep.subr.bf16.mxu1 %v271_v0 }
   0xf   :  { %244 = vmatpush3.bf16.msra.mxu1 %v262_v8 }
  0x10   :  { %245 = vmatprep.subr.bf16.mxu1 %v271_v0 }
  0x13   :  { %246 = vmatpush3.bf16.msra.mxu1 %v263_v9 }
  0x14   :  { %247 = vmatprep.subr.bf16.mxu1 %v271_v0 }
  0x17   :  { %248 = vmatpush3.bf16.msra.mxu1 %v264_v10 }
  0x18   :  { %249 = vmatprep.subr.bf16.mxu1 %v271_v0 }
  0x1b   :  { %250 = vmatpush3.bf16.msra.mxu1 %v265_v11 }
  0x1c   :  { %251 = vmatprep.subr.bf16.mxu1 %v271_v0 }
  0x1f   :  { %252 = vmatpush3.bf16.msra.mxu1 %v266_v12 }
  0xc6   :  { %v73_v14 = vpop.f32.mrf.mxu0 }
  0xc7   :  { %v74_v15 = vadd.f32 %v209_v13, %v73_v14 }
  0xc8   :  { %v235_v16 = vpop.f32.mrf.mxu0 }
  0xc9   :  { %v79_v17 = vmax.f32 %v74_v15, 0.0 }
  0xca   :  { %v76_v18 = vpop.f32.mrf.mxu0 }
  0xcb   :  { %v80_v19 = vpack.c.bf16 %v79_v17, %v79_v17 }
  0xcc   :  { %v236_v20 = vpop.f32.mrf.mxu0 }
  0xcd   :  { %254 = vmatmul.mubr.bf16.vlgmr.msra.gmra.mxu1 %v80_v19 }
 0x18d   :  { %v186_v22 = vpop.f32.mrf.mxu1 }
 0x18e   :  { %v187_v23 = vadd.f32 %v211_v21, %v186_v22 }
 0x18f   :  { %v255_v24 = vpop.f32.mrf.mxu1 }
 0x190   :  { %v193_v25 = vsel %vm192_vm3, %v187_v23, -inf }
 0x191   :  { %194 = vmax.xlane.f32.xlu0 %v193_v25  ;;  %v189_v26 = vpop.f32.mrf.mxu1 }
 0x193   :  { %v256_v27 = vpop.f32.mrf.mxu1 }
 0x21a   :  { %v195_v28 = vpop.xlane.xlu0 %194 }
 0x21b   :  { %v196_v29 = vsub.f32 %v187_v23, %v195_v28 }
 0x21d   :  { %v197_v30 = vmul.f32 1.442695, %v196_v29 }
 0x21f   :  { %267 = vpow2.f32 %v197_v30 }
 0x22c   :  { %v268_v31 = vpop.eup %267 }
 0x22d   :  { %v199_v32 = vsel %vm192_vm3, %v268_v31, 0.0 }
 0x22e   :  { %200 = vadd.xlane.f32.xlu0 %v199_v32 }
 0x2b7   :  { %v201_v33 = vpop.xlane.xlu0 %200 }
 0x2b8   :  { %269 = vrcp.f32 %v201_v33 }
 0x2c5   :  { %v270_v34 = vpop.eup %269 }
 0x2c6   :  { %v203_v35 = vmul.f32 %v270_v34, %v268_v31 }
 0x2c8   :  { %204 = vst.msk [vmem:[%s350_s5] sm:$0xff] %vm192_vm3, %v203_v35 }

</bundles_post_ra>
